<compile_context>
chip_gen: v7x
topology: tpu7x:2x2x1
jax: 0.10.0
libtpu: 0.0.40
codegen_flags: <defaults>
</compile_context>

<pallas_src>
import functools

import jax
import jax.numpy as jnp
from jax.experimental import pallas as pl
from jax.experimental.pallas import tpu as pltpu


def _round_up(x: int, m: int) -> int:
  return ((x + m - 1) // m) * m


def _shrink_tile(t: int, n: int, max_waste: float = 0.125) -> int:
  """Halve a power-of-two tile until padding waste along this axis is small."""
  while t > 128 and _round_up(n, t) > (1.0 + max_waste) * n:
    t //= 2
  return t


# Column operand kept fully VMEM-resident up to this size (x2 for buffering,
# + 2 x 2 MiB output tiles + row blocks stays < 32 MiB scoped VMEM -> v7x-safe).
_RESIDENT_COL_BYTES = 8 * 1024 * 1024


def _cosine_dist_kernel_streaming(xi_ref, xj_ref, d_ref):
  """One (tm, tn) tile of D = 1 - Xr @ Xc^T (inputs already L2-normalized)."""
  sim = jax.lax.dot_general(
      xi_ref[...], xj_ref[...],
      dimension_numbers=(((1,), (1,)), ((), ())),   # contract last dims (NT form)
      preferred_element_type=jnp.float32)
  d_ref[...] = (1.0 - sim).astype(d_ref.dtype)


def _cosine_dist_kernel_resident(xi_ref, xcols_ref, d_ref, *, tn):
  """Same tile, but the whole column matrix is resident in VMEM; slice it."""
  j = pl.program_id(1)
  start = pl.multiple_of(j * tn, tn)
  xj = xcols_ref[pl.ds(start, tn), :]
  sim = jax.lax.dot_general(
      xi_ref[...], xj,
      dimension_numbers=(((1,), (1,)), ((), ())),
      preferred_element_type=jnp.float32)
  d_ref[...] = (1.0 - sim).astype(d_ref.dtype)


def _pairwise_cosine_distance_padded(x_rows, x_cols, tm, tn, out_dtype):
  n_rows, d = x_rows.shape
  n_cols, _ = x_cols.shape
  grid = (n_rows // tm, n_cols // tn)

  col_bytes = n_cols * d * x_cols.dtype.itemsize
  resident = col_bytes <= _RESIDENT_COL_BYTES

  if resident:
    # Column matrix loaded into VMEM exactly once (block index never changes);
    # only remaining HBM traffic is the N^2 output writeback.
    kernel = functools.partial(_cosine_dist_kernel_resident, tn=tn)
    col_spec = pl.BlockSpec((n_cols, d), lambda i, j: (0, 0))
  else:
    # Streaming fallback for very large N; default double-buffering is enough
    # (the exposed DMA here is the output writeback, not the tiny input block).
    kernel = _cosine_dist_kernel_streaming
    col_spec = pl.BlockSpec((tn, d), lambda i, j: (j, 0))

  return pl.pallas_call(
      kernel,
      out_shape=jax.ShapeDtypeStruct((n_rows, n_cols), out_dtype),
      grid_spec=pltpu.PrefetchScalarGridSpec(
          num_scalar_prefetch=0,
          grid=grid,
          in_specs=[
              pl.BlockSpec((tm, d), lambda i, j: (i, 0)),   # row block
              col_spec,                                     # column operand
          ],
          out_specs=pl.BlockSpec((tm, tn), lambda i, j: (i, j)),
      ),
      compiler_params=pltpu.CompilerParams(
          dimension_semantics=("parallel", "parallel")),
  )(x_rows, x_cols)


def pairwise_cosine_distance(embeddings: jnp.ndarray,
                             tm: int = 512,
                             tn: int = 2048,
                             out_dtype=jnp.bfloat16) -> jnp.ndarray:
  """[N, N] cosine distance matrix (UMAP metric='cosine'), Pallas-tiled."""
  n, _ = embeddings.shape

  # Hoisted normalization: done ONCE here instead of once per grid step.
  x = embeddings.astype(jnp.float32)
  inv_norm = jax.lax.rsqrt(jnp.sum(x * x, axis=-1, keepdims=True) + 1e-12)
  x_norm = (x * inv_norm).astype(jnp.bfloat16)     # bf16 MXU operands

  # Shrink tiles for small problems (keep powers of two >= 128 so stores stay
  # lane-dense), then shrink further if padding waste along an axis is large.
  n_pow = max(128, pl.next_power_of_2(n))
  tm = _shrink_tile(min(tm, n_pow), n)
  tn = _shrink_tile(min(tn, n_pow), n)

  # Independent row / column padding so a large tn doesn't inflate the
  # dominant N^2 writeback through the row padding (and vice versa).
  n_rows = _round_up(n, tm)
  n_cols = _round_up(n, tn)
  x_rows = jnp.pad(x_norm, ((0, n_rows - n), (0, 0))) if n_rows != n else x_norm
  x_cols = jnp.pad(x_norm, ((0, n_cols - n), (0, 0))) if n_cols != n else x_norm

  dist = _pairwise_cosine_distance_padded(x_rows, x_cols, tm, tn, out_dtype)
  # Padded rows/cols have distance exactly 1.0; slice them off before any
  # consumer (in particular the k-NN selection) sees them.
  return dist[:n, :n]


class UMAPKernel:
  """JAX/Pallas counterpart of the UMAP metric module (compute hot path only)."""

  def __init__(self, color_map):
    # color_map only affects the matplotlib legend/colors; kept for parity.
    self.color_map = color_map

  def forward(self, embeddings: jnp.ndarray, targets: jnp.ndarray):
    n = embeddings.shape[0]
    n_neighbors = min(200, n)          # umap.UMAP(n_neighbors=200)

    # Pallas hot path: pairwise cosine distances (bf16 output halves the
    # dominant N^2 HBM writeback; documented reduced precision is acceptable
    # for UMAP's k-NN graph / fuzzy-set weights).
    dist = pairwise_cosine_distance(embeddings)

    # Plain-JAX glue: k-NN graph (first stage of UMAP.fit_transform).
    # approx_min_k lowers to the TPU-native PartialReduce path — far cheaper
    # than a full top_k/sort at k=200, and UMAP tolerates approximate
    # neighbors.  The exact global row minimum (self) is always retained.
    # TODO(synk): for very large N, emit (tm x N) row panels and fuse a
    #             streaming per-panel selection instead of materializing the
    #             full N x N matrix (removes the second N^2 HBM pass entirely).
    knn_dists, knn_idx = jax.lax.approx_min_k(
        dist, n_neighbors, recall_target=0.95)
    knn_dists = knn_dists.astype(jnp.float32)       # (N, n_neighbors)

    # TODO(synk): fuzzy simplicial set, spectral init + SGD layout optimization
    #             and the matplotlib.figure.Figure (per-label scatter using
    #             `targets` / self.color_map) have no Pallas equivalent.
    return dist, knn_dists, knn_idx


if __name__ == "__main__":
  key = jax.random.PRNGKey(0)
  k_emb, k_tgt = jax.random.split(key)

  N, D = 256, 64  # small, tile-friendly shapes
  embeddings = jax.random.normal(k_emb, (N, D), dtype=jnp.float32)
  targets = jax.random.randint(k_tgt, (N,), 0, 3, dtype=jnp.int32)

  color_map = {"class_a": "red", "class_b": "green", "class_c": "blue"}
  module = UMAPKernel(color_map)

  dist, knn_dists, knn_idx = module.forward(embeddings, targets)
  jax.block_until_ready((dist, knn_dists, knn_idx))

  # Sanity checks (tolerances loosened for bf16 operands + bf16 output).
  assert dist.shape == (N, N)
  assert knn_dists.shape == (N, 200) and knn_idx.shape == (N, 200)
  d32 = dist.astype(jnp.float32)

  # Plain-JAX f32 reference.
  xn = embeddings / jnp.linalg.norm(embeddings, axis=-1, keepdims=True)
  ref = 1.0 - xn @ xn.T
  assert float(jnp.max(jnp.abs(d32 - ref))) < 5e-2
  assert float(jnp.max(jnp.abs(jnp.diagonal(d32)))) < 2e-2
  assert float(jnp.max(jnp.abs(d32 - d32.T))) < 2e-2
  assert float(jnp.min(d32)) > -2e-2 and float(jnp.max(d32)) < 2.0 + 2e-2
  # Each point's nearest neighbor is (numerically) itself — the exact row
  # minimum is always kept by approx_min_k's per-bin reduction + aggregation.
  assert float(jnp.max(knn_dists[:, 0])) < 5e-2

  print("KERNEL_OK")
</pallas_src>

<mosaic_0001>
module attributes {stable_mosaic.version = 11 : i64} {
  func.func @_cosine_dist_kernel_resident(%arg0: i32, %arg1: i32, %arg2: memref<256x64xbf16, #tpu.memory_space<vmem>>, %arg3: memref<256x64xbf16, #tpu.memory_space<vmem>>, %arg4: memref<256x256xbf16, #tpu.memory_space<vmem>>) attributes {dimension_semantics = [#tpu.dimension_semantics<parallel>, #tpu.dimension_semantics<parallel>], iteration_bounds = array<i64: 1, 1>, scalar_prefetch = 0 : i64, scratch_operands = 0 : i64, tpu.core_type = #tpu.core_type<tc>, window_params = [{transform_indices = @transform_0, window_bounds = array<i64: 256, 64>}, {pipeline_mode = #tpu.pipeline_mode<synchronous>, transform_indices = @transform_1, window_bounds = array<i64: 256, 64>}, {transform_indices = @transform_2, window_bounds = array<i64: 256, 256>}]} {
    %c256_i32 = arith.constant 256 : i32
    %0 = arith.muli %arg1, %c256_i32 : i32
    %1 = tpu.assume_multiple %0, 256 : i32
    %2 = arith.index_cast %1 : i32 to index
    %c0 = arith.constant 0 : index
    %3 = vector.load %arg3[%2, %c0] : memref<256x64xbf16, #tpu.memory_space<vmem>>, vector<256x64xbf16>
    %c0_0 = arith.constant 0 : index
    %c0_1 = arith.constant 0 : index
    %4 = vector.load %arg2[%c0_0, %c0_1] : memref<256x64xbf16, #tpu.memory_space<vmem>>, vector<256x64xbf16>
    %cst = arith.constant dense<0.000000e+00> : vector<256x256xf32>
    %5 = tpu.matmul %4, %3, %cst {dimension_numbers = #tpu.dot_dimension_numbers<[1], [1], [0], [0], [0, 0, 1, 0], [], []>} : vector<256x64xbf16>, vector<256x64xbf16>, vector<256x256xf32> -> vector<256x256xf32>
    %cst_2 = arith.constant 1.000000e+00 : f32
    %6 = vector.broadcast %cst_2 : f32 to vector<256x256xf32>
    %7 = arith.subf %6, %5 : vector<256x256xf32>
    %8 = arith.truncf %7 : vector<256x256xf32> to vector<256x256xbf16>
    %c0_3 = arith.constant 0 : index
    %c0_4 = arith.constant 0 : index
    %9 = vector.load %arg4[%c0_3, %c0_4] : memref<256x256xbf16, #tpu.memory_space<vmem>>, vector<256x256xbf16>
    tpu.vector_store %arg4[%c0_3, %c0_4], %8 {strides = array<i32>} : memref<256x256xbf16, #tpu.memory_space<vmem>>, vector<256x256xbf16>,
    return
  }
  func.func @transform_0(%arg0: i32, %arg1: i32) -> (i32, i32) {
    %c0_i32 = arith.constant 0 : i32
    %c0_i32_0 = arith.constant 0 : i32
    return %arg0, %c0_i32 : i32, i32
  }
  func.func @transform_1(%arg0: i32, %arg1: i32) -> (i32, i32) {
    %c0_i32 = arith.constant 0 : i32
    %c0_i32_0 = arith.constant 0 : i32
    %c0_i32_1 = arith.constant 0 : i32
    return %c0_i32, %c0_i32_0 : i32, i32
  }
  func.func @transform_2(%arg0: i32, %arg1: i32) -> (i32, i32) {
    %c0_i32 = arith.constant 0 : i32
    return %arg0, %arg1 : i32, i32
  }
}

</mosaic_0001>

<bundles_post_ra>
// kernel: tpu_custom_call.1
= control target key start
LH: loop header
LB: loop body
LE: loop exit
PB: predicated region body
PF: predicated region fallthrough
CT: control target
= control target key end

     0   :  { %vm242_vm0 = vcmask 523264   ;;  %s1271_s0 = inlined_call_operand.vmem [shape: bf16[256,64], index: 0, kind: input, shape index: {}]   ;;  %s1272_s1 = inlined_call_operand.vmem [shape: bf16[256,64], index: 1, kind: input, shape index: {}]   ;;  %s1273_s2 = inlined_call_operand.hbm [shape: bf16[256,256], index: 2, kind: output, shape index: {}]  }
   0x1   :  { %v1033_v0 = vld [vmem:[%s1272_s1 + $0x40] sm:$0xff]   ;;  %v1035_v2 = vld [vmem:[%s1272_s1 + $0x48] sm:$0xff]   ;;  %v1037_v6 = vld [vmem:[%s1272_s1 + $0x50] sm:$0xff]  }
   0x2   :  { %v1034_v1 = vld [vmem:[%s1272_s1] sm:$0xff]   ;;  %1014 = vmatprep.subr.msk.bf16.mxu0 %vm242_vm0, %v1033_v0  ;;  %1015 = vmatprep.subr.msk.bf16.mxu1 %vm242_vm0, %v1033_v0  ;;  %v1036_v4 = vld [vmem:[%s1272_s1 + $0x8] sm:$0xff]   ;;  %v1038_v7 = vld [vmem:[%s1272_s1 + $0x10] sm:$0xff]  }
   0x3   :  { %v292_v3 = vsel %vm242_vm0, %v1034_v1, 0  ;;  %v295_v5 = vsel %vm242_vm0, %v1036_v4, 0  ;;  %v1039_v8 = vld [vmem:[%s1272_s1 + $0x58] sm:$0xff]   ;;  %v1049_v9 = vld [vmem:[%s1271_s0] sm:$0xff]   ;;  %v298_v10 = vsel %vm242_vm0, %v1038_v7, 0 }
   0x4   :  { %951 = vmatpush3.bf16.xpose.msra.mxu0 %v292_v3  ;;  %1006 = vmatpush3.bf16.xpose.msra.mxu1 %v292_v3  ;;  %v1050_v11 = vld [vmem:[%s1271_s0 + $0x40] sm:$0xff]   ;;  %v1040_v12 = vld [vmem:[%s1272_s1 + $0x18] sm:$0xff]  }
   0x5   :  { %1016 = vmatprep.subr.msk.bf16.mxu0 %vm242_vm0, %v1035_v2  ;;  %1017 = vmatprep.subr.msk.bf16.mxu1 %vm242_vm0, %v1035_v2  ;;  %v301_v13 = vsel %vm242_vm0, %v1040_v12, 0  ;;  %v1041_v14 = vld [vmem:[%s1272_s1 + $0x60] sm:$0xff]  }
   0x6   :  { %966 = vmatprep.mubr.msk.bf16.mxu0 %vm242_vm0, %v1049_v9  ;;  %982 = vmatprep.mubr.msk.bf16.mxu1 %vm242_vm0, %v1050_v11  ;;  %v1042_v15 = vld [vmem:[%s1272_s1 + $0x20] sm:$0xff]  }
   0xc   :  { %953 = vmatpush3.bf16.xpose.msra.mxu0 %v295_v5  ;;  %1007 = vmatpush3.bf16.xpose.msra.mxu1 %v295_v5 }
   0xd   :  { %1018 = vmatprep.subr.msk.bf16.mxu0 %vm242_vm0, %v1037_v6  ;;  %1019 = vmatprep.subr.msk.bf16.mxu1 %vm242_vm0, %v1037_v6 }
  0x14   :  { %955 = vmatpush3.bf16.xpose.msra.mxu0 %v298_v10  ;;  %1008 = vmatpush3.bf16.xpose.msra.mxu1 %v298_v10 }
  0x15   :  { %1020 = vmatprep.subr.msk.bf16.mxu0 %vm242_vm0, %v1039_v8  ;;  %1021 = vmatprep.subr.msk.bf16.mxu1 %vm242_vm0, %v1039_v8 }
  0x1c   :  { %957 = vmatpush3.bf16.xpose.msra.mxu0 %v301_v13  ;;  %1009 = vmatpush3.bf16.xpose.msra.mxu1 %v301_v13 }
  0x1d   :  { %1022 = vmatprep.subr.msk.bf16.mxu0 %vm242_vm0, %v1041_v14  ;;  %1023 = vmatprep.subr.msk.bf16.mxu1 %vm242_vm0, %v1041_v14 }
  0x1e   :  { %7 = vsyncpa [#allocation3], 0  ;;  %v304_v16 = vsel %vm242_vm0, %v1042_v15, 0  ;;  %v1043_v17 = vld [vmem:[%s1272_s1 + $0x68] sm:$0xff]   ;;  %v1045_v20 = vld [vmem:[%s1272_s1 + $0x70] sm:$0xff]  }
  0x1f   :  { %v1044_v18 = vld [vmem:[%s1272_s1 + $0x28] sm:$0xff]   ;;  %v1046_v21 = vld [vmem:[%s1272_s1 + $0x30] sm:$0xff]   ;;  %v1047_v23 = vld [vmem:[%s1272_s1 + $0x78] sm:$0xff]  }
  0x20   :  { %v307_v19 = vsel %vm242_vm0, %v1044_v18, 0  ;;  %v310_v22 = vsel %vm242_vm0, %v1046_v21, 0  ;;  %v1048_v24 = vld [vmem:[%s1272_s1 + $0x38] sm:$0xff]   ;;  %v1051_v26 = vld [vmem:[%s1271_s0 + $0x8] sm:$0xff]   ;;  %v1053_v28 = vld [vmem:[%s1271_s0 + $0x10] sm:$0xff]  }
  0x21   :  { %v313_v25 = vsel %vm242_vm0, %v1048_v24, 0  ;;  %v1052_v27 = vld [vmem:[%s1271_s0 + $0x48] sm:$0xff]   ;;  %v1054_v29 = vld [vmem:[%s1271_s0 + $0x50] sm:$0xff]   ;;  %v1055_v30 = vld [vmem:[%s1271_s0 + $0x18] sm:$0xff]  }
  0x22   :  { %v1056_v31 = vld [vmem:[%s1271_s0 + $0x58] sm:$0xff]   ;;  %v1057_v32 = vld [vmem:[%s1271_s0 + $0x20] sm:$0xff]   ;;  %v1059_v34 = vld [vmem:[%s1271_s0 + $0x28] sm:$0xff]  }
  0x23   :  { %v1058_v33 = vld [vmem:[%s1271_s0 + $0x60] sm:$0xff]   ;;  %v1060_v35 = vld [vmem:[%s1271_s0 + $0x68] sm:$0xff]   ;;  %v1061_v36 = vld [vmem:[%s1271_s0 + $0x30] sm:$0xff]  }
  0x24   :  { %959 = vmatpush3.bf16.xpose.msra.mxu0 %v304_v16  ;;  %1010 = vmatpush3.bf16.xpose.msra.mxu1 %v304_v16  ;;  %v1062_v37 = vld [vmem:[%s1271_s0 + $0x70] sm:$0xff]   ;;  %v1063_v38 = vld [vmem:[%s1271_s0 + $0x38] sm:$0xff]  }
  0x25   :  { %1024 = vmatprep.subr.msk.bf16.mxu0 %vm242_vm0, %v1043_v17  ;;  %1025 = vmatprep.subr.msk.bf16.mxu1 %vm242_vm0, %v1043_v17  ;;  %v1064_v39 = vld [vmem:[%s1271_s0 + $0x78] sm:$0xff]   ;;  %s1089_s0 = smov [#allocation2]  }
  0x26   :  { %s825_s16 = sshll.u32 %s1089_s0, 4  ;;  %s826_s16 = int_to_ptr.vmem [resolvable:$true] %s825_s16 }
  0x27   :  { %s1065_s17 = scalar_lea.vmem %s826_s16, 4096  ;;  %p1070_p1 = scmp.lt.s32.totalorder %s826_s16, %s826_s16 }
  0x28   :  { %p1066_p0 = scmp.ne.s32.totalorder %s826_s16, %s1065_s17  ;;  %p1071_p2 = scmp.lt.s32.totalorder %s1065_s17, %s1065_s17 }
  0x2a   :  { %p1072_p3 = por %p1071_p2, %p1070_p1 }
  0x2c   :  { %961 = vmatpush3.bf16.xpose.msra.mxu0 %v307_v19  ;;  %1011 = vmatpush3.bf16.xpose.msra.mxu1 %v307_v19  ;;  %p1073_p4 = pnand %p1072_p3, %p1066_p0 }
  0x2d   :  { %1026 = vmatprep.subr.msk.bf16.mxu0 %vm242_vm0, %v1045_v20  ;;  %1027 = vmatprep.subr.msk.bf16.mxu1 %vm242_vm0, %v1045_v20 }
  0x34   :  { %963 = vmatpush3.bf16.xpose.msra.mxu0 %v310_v22  ;;  %1012 = vmatpush3.bf16.xpose.msra.mxu1 %v310_v22 }
  0x35   :  { %1028 = vmatprep.subr.msk.bf16.mxu0 %vm242_vm0, %v1047_v23  ;;  %1029 = vmatprep.subr.msk.bf16.mxu1 %vm242_vm0, %v1047_v23 }
  0x3c   :  { %965 = vmatpush3.bf16.xpose.msra.mxu0 %v313_v25  ;;  %1013 = vmatpush3.bf16.xpose.msra.mxu1 %v313_v25 }
  0x43   :  { %967 = vmatmul.mubr.msk.bf16.vlgmr.msra.gmra.mrb[0].mxu0 %vm242_vm0, %v1049_v9  ;;  %983 = vmatmul.mubr.msk.bf16.vlgmr.msra.gmra.mrb[0].mxu1 %vm242_vm0, %v1050_v11 }
  0x44   :  { %968 = vmatprep.mubr.msk.bf16.mxu0 %vm242_vm0, %v1051_v26  ;;  %984 = vmatprep.mubr.msk.bf16.mxu1 %vm242_vm0, %v1052_v27 }
  0x4b   :  { %969 = vmatmul.mubr.msk.bf16.gmra.mrb[4].mxu0 %vm242_vm0, %v1051_v26  ;;  %985 = vmatmul.mubr.msk.bf16.gmra.mrb[4].mxu1 %vm242_vm0, %v1052_v27 }
  0x4c   :  { %970 = vmatprep.mubr.msk.bf16.mxu0 %vm242_vm0, %v1053_v28  ;;  %986 = vmatprep.mubr.msk.bf16.mxu1 %vm242_vm0, %v1054_v29 }
  0x53   :  { %971 = vmatmul.mubr.msk.bf16.gmra.mrb[8].mxu0 %vm242_vm0, %v1053_v28  ;;  %987 = vmatmul.mubr.msk.bf16.gmra.mrb[8].mxu1 %vm242_vm0, %v1054_v29 }
  0x54   :  { %972 = vmatprep.mubr.msk.bf16.mxu0 %vm242_vm0, %v1055_v30  ;;  %988 = vmatprep.mubr.msk.bf16.mxu1 %vm242_vm0, %v1056_v31 }
  0x5b   :  { %973 = vmatmul.mubr.msk.bf16.gmra.mrb[12].mxu0 %vm242_vm0, %v1055_v30  ;;  %989 = vmatmul.mubr.msk.bf16.gmra.mrb[12].mxu1 %vm242_vm0, %v1056_v31 }
  0x5c   :  { %974 = vmatprep.mubr.msk.bf16.mxu0 %vm242_vm0, %v1057_v32  ;;  %990 = vmatprep.mubr.msk.bf16.mxu1 %vm242_vm0, %v1058_v33 }
  0x63   :  { %975 = vmatmul.mubr.msk.bf16.gmra.mrb[16].mxu0 %vm242_vm0, %v1057_v32  ;;  %991 = vmatmul.mubr.msk.bf16.gmra.mrb[16].mxu1 %vm242_vm0, %v1058_v33 }
  0x64   :  { %976 = vmatprep.mubr.msk.bf16.mxu0 %vm242_vm0, %v1059_v34  ;;  %992 = vmatprep.mubr.msk.bf16.mxu1 %vm242_vm0, %v1060_v35 }
  0x6b   :  { %977 = vmatmul.mubr.msk.bf16.gmra.mrb[20].mxu0 %vm242_vm0, %v1059_v34  ;;  %993 = vmatmul.mubr.msk.bf16.gmra.mrb[20].mxu1 %vm242_vm0, %v1060_v35 }
  0x6c   :  { %978 = vmatprep.mubr.msk.bf16.mxu0 %vm242_vm0, %v1061_v36  ;;  %994 = vmatprep.mubr.msk.bf16.mxu1 %vm242_vm0, %v1062_v37 }
  0x73   :  { %979 = vmatmul.mubr.msk.bf16.gmra.mrb[24].mxu0 %vm242_vm0, %v1061_v36  ;;  %995 = vmatmul.mubr.msk.bf16.gmra.mrb[24].mxu1 %vm242_vm0, %v1062_v37 }
  0x74   :  { %980 = vmatprep.mubr.msk.bf16.mxu0 %vm242_vm0, %v1063_v38  ;;  %996 = vmatprep.mubr.msk.bf16.mxu1 %vm242_vm0, %v1064_v39 }
  0x7b   :  { %981 = vmatmul.mubr.msk.bf16.gmra.mrb[28].mxu0 %vm242_vm0, %v1063_v38  ;;  %997 = vmatmul.mubr.msk.bf16.gmra.mrb[28].mxu1 %vm242_vm0, %v1064_v39 }
 0x116   :  { %v373_v40 = vpop.f32.mrb[0].mxu0  ;;  %v453_v41 = vpop.f32.mrb[0].mxu1 }
 0x117   :  { %v532_v42 = vsub.f32 1.0, %v373_v40  ;;  %v564_v43 = vsub.f32 1.0, %v453_v41  ;;  %v375_v44 = vpop.f32.mrb[1].mxu0  ;;  %v455_v45 = vpop.f32.mrb[1].mxu1 }
 0x118   :  { %v533_v46 = vsub.f32 1.0, %v375_v44  ;;  %v565_v47 = vsub.f32 1.0, %v455_v45  ;;  %v377_v48 = vpop.f32.mrb[2].mxu0  ;;  %v457_v49 = vpop.f32.mrb[2].mxu1 }
 0x119   :  { %v534_v50 = vsub.f32 1.0, %v377_v48  ;;  %v566_v51 = vsub.f32 1.0, %v457_v49  ;;  %v379_v52 = vpop.f32.mrb[3].mxu0  ;;  %v459_v53 = vpop.f32.mrb[3].mxu1 }
 0x11a   :  { %v918_v54 = vpack.c.bf16 %v533_v46, %v532_v42  ;;  %v934_v55 = vpack.c.bf16 %v565_v47, %v564_v43  ;;  %v535_v56 = vsub.f32 1.0, %v379_v52  ;;  %v567_v57 = vsub.f32 1.0, %v459_v53 }
 0x11c   :  { %788 = vst [vmem:[#allocation2] sm:$0xff] %v918_v54  ;;  %804 = vst [vmem:[#allocation2 + $0x80] sm:$0xff] %v934_v55  ;;  %v919_v58 = vpack.c.bf16 %v535_v56, %v534_v50  ;;  %v935_v59 = vpack.c.bf16 %v567_v57, %v566_v51 }
 0x11e   :  { %789 = vst [vmem:[#allocation2 + $0x8] sm:$0xff] %v919_v58  ;;  %805 = vst [vmem:[#allocation2 + $0x88] sm:$0xff] %v935_v59  ;;  %v383_v60 = vpop.f32.mrb[4].mxu0  ;;  %v463_v61 = vpop.f32.mrb[4].mxu1 }
 0x11f   :  { %v536_v62 = vsub.f32 1.0, %v383_v60  ;;  %v568_v63 = vsub.f32 1.0, %v463_v61  ;;  %v385_v0 = vpop.f32.mrb[5].mxu0  ;;  %v465_v1 = vpop.f32.mrb[5].mxu1 }
 0x120   :  { %v537_v2 = vsub.f32 1.0, %v385_v0  ;;  %v569_v3 = vsub.f32 1.0, %v465_v1  ;;  %v387_v4 = vpop.f32.mrb[6].mxu0  ;;  %v467_v5 = vpop.f32.mrb[6].mxu1 }
 0x121   :  { %v538_v6 = vsub.f32 1.0, %v387_v4  ;;  %v570_v7 = vsub.f32 1.0, %v467_v5  ;;  %v389_v8 = vpop.f32.mrb[7].mxu0  ;;  %v469_v9 = vpop.f32.mrb[7].mxu1 }
 0x122   :  { %v920_v10 = vpack.c.bf16 %v537_v2, %v536_v62  ;;  %v936_v11 = vpack.c.bf16 %v569_v3, %v568_v63  ;;  %v539_v12 = vsub.f32 1.0, %v389_v8  ;;  %v571_v13 = vsub.f32 1.0, %v469_v9 }
 0x124   :  { %790 = vst [vmem:[#allocation2 + $0x10] sm:$0xff] %v920_v10  ;;  %806 = vst [vmem:[#allocation2 + $0x90] sm:$0xff] %v936_v11  ;;  %v921_v14 = vpack.c.bf16 %v539_v12, %v538_v6  ;;  %v937_v15 = vpack.c.bf16 %v571_v13, %v570_v7 }
 0x126   :  { %791 = vst [vmem:[#allocation2 + $0x18] sm:$0xff] %v921_v14  ;;  %807 = vst [vmem:[#allocation2 + $0x98] sm:$0xff] %v937_v15  ;;  %v393_v16 = vpop.f32.mrb[8].mxu0  ;;  %v473_v17 = vpop.f32.mrb[8].mxu1 }
 0x127   :  { %v540_v18 = vsub.f32 1.0, %v393_v16  ;;  %v572_v19 = vsub.f32 1.0, %v473_v17  ;;  %v395_v20 = vpop.f32.mrb[9].mxu0  ;;  %v475_v21 = vpop.f32.mrb[9].mxu1 }
 0x128   :  { %v541_v22 = vsub.f32 1.0, %v395_v20  ;;  %v573_v23 = vsub.f32 1.0, %v475_v21  ;;  %v397_v24 = vpop.f32.mrb[10].mxu0  ;;  %v477_v25 = vpop.f32.mrb[10].mxu1 }
 0x129   :  { %v542_v26 = vsub.f32 1.0, %v397_v24  ;;  %v574_v27 = vsub.f32 1.0, %v477_v25  ;;  %v399_v28 = vpop.f32.mrb[11].mxu0  ;;  %v479_v29 = vpop.f32.mrb[11].mxu1 }
 0x12a   :  { %v922_v30 = vpack.c.bf16 %v541_v22, %v540_v18  ;;  %v938_v31 = vpack.c.bf16 %v573_v23, %v572_v19  ;;  %v543_v32 = vsub.f32 1.0, %v399_v28  ;;  %v575_v33 = vsub.f32 1.0, %v479_v29 }
 0x12c   :  { %792 = vst [vmem:[#allocation2 + $0x20] sm:$0xff] %v922_v30  ;;  %808 = vst [vmem:[#allocation2 + $0xa0] sm:$0xff] %v938_v31  ;;  %v923_v34 = vpack.c.bf16 %v543_v32, %v542_v26  ;;  %v939_v35 = vpack.c.bf16 %v575_v33, %v574_v27 }
 0x12e   :  { %793 = vst [vmem:[#allocation2 + $0x28] sm:$0xff] %v923_v34  ;;  %809 = vst [vmem:[#allocation2 + $0xa8] sm:$0xff] %v939_v35  ;;  %v403_v36 = vpop.f32.mrb[12].mxu0  ;;  %v483_v37 = vpop.f32.mrb[12].mxu1 }
 0x12f   :  { %v544_v38 = vsub.f32 1.0, %v403_v36  ;;  %v576_v39 = vsub.f32 1.0, %v483_v37  ;;  %v405_v40 = vpop.f32.mrb[13].mxu0  ;;  %v485_v41 = vpop.f32.mrb[13].mxu1 }
 0x130   :  { %v545_v42 = vsub.f32 1.0, %v405_v40  ;;  %v577_v43 = vsub.f32 1.0, %v485_v41  ;;  %v407_v44 = vpop.f32.mrb[14].mxu0  ;;  %v487_v45 = vpop.f32.mrb[14].mxu1 }
 0x131   :  { %v546_v46 = vsub.f32 1.0, %v407_v44  ;;  %v578_v47 = vsub.f32 1.0, %v487_v45  ;;  %v409_v48 = vpop.f32.mrb[15].mxu0  ;;  %v489_v49 = vpop.f32.mrb[15].mxu1 }
 0x132   :  { %v924_v50 = vpack.c.bf16 %v545_v42, %v544_v38  ;;  %v940_v51 = vpack.c.bf16 %v577_v43, %v576_v39  ;;  %v547_v52 = vsub.f32 1.0, %v409_v48  ;;  %v579_v53 = vsub.f32 1.0, %v489_v49 }
 0x134   :  { %794 = vst [vmem:[#allocation2 + $0x30] sm:$0xff] %v924_v50  ;;  %810 = vst [vmem:[#allocation2 + $0xb0] sm:$0xff] %v940_v51  ;;  %v925_v54 = vpack.c.bf16 %v547_v52, %v546_v46  ;;  %v941_v55 = vpack.c.bf16 %v579_v53, %v578_v47 }
 0x136   :  { %795 = vst [vmem:[#allocation2 + $0x38] sm:$0xff] %v925_v54  ;;  %811 = vst [vmem:[#allocation2 + $0xb8] sm:$0xff] %v941_v55  ;;  %v413_v56 = vpop.f32.mrb[16].mxu0  ;;  %v493_v57 = vpop.f32.mrb[16].mxu1 }
 0x137   :  { %v548_v58 = vsub.f32 1.0, %v413_v56  ;;  %v580_v59 = vsub.f32 1.0, %v493_v57  ;;  %v415_v60 = vpop.f32.mrb[17].mxu0  ;;  %v495_v61 = vpop.f32.mrb[17].mxu1 }
 0x138   :  { %v549_v62 = vsub.f32 1.0, %v415_v60  ;;  %v581_v63 = vsub.f32 1.0, %v495_v61  ;;  %v417_v0 = vpop.f32.mrb[18].mxu0  ;;  %v497_v1 = vpop.f32.mrb[18].mxu1 }
 0x139   :  { %v550_v2 = vsub.f32 1.0, %v417_v0  ;;  %v582_v3 = vsub.f32 1.0, %v497_v1  ;;  %v419_v4 = vpop.f32.mrb[19].mxu0  ;;  %v499_v5 = vpop.f32.mrb[19].mxu1 }
 0x13a   :  { %v926_v6 = vpack.c.bf16 %v549_v62, %v548_v58  ;;  %v942_v7 = vpack.c.bf16 %v581_v63, %v580_v59  ;;  %v551_v8 = vsub.f32 1.0, %v419_v4  ;;  %v583_v9 = vsub.f32 1.0, %v499_v5 }
 0x13c   :  { %796 = vst [vmem:[#allocation2 + $0x40] sm:$0xff] %v926_v6  ;;  %812 = vst [vmem:[#allocation2 + $0xc0] sm:$0xff] %v942_v7  ;;  %v927_v10 = vpack.c.bf16 %v551_v8, %v550_v2  ;;  %v943_v11 = vpack.c.bf16 %v583_v9, %v582_v3 }
 0x13e   :  { %797 = vst [vmem:[#allocation2 + $0x48] sm:$0xff] %v927_v10  ;;  %813 = vst [vmem:[#allocation2 + $0xc8] sm:$0xff] %v943_v11  ;;  %v423_v12 = vpop.f32.mrb[20].mxu0  ;;  %v503_v13 = vpop.f32.mrb[20].mxu1 }
 0x13f   :  { %v552_v14 = vsub.f32 1.0, %v423_v12  ;;  %v584_v15 = vsub.f32 1.0, %v503_v13  ;;  %v425_v16 = vpop.f32.mrb[21].mxu0  ;;  %v505_v17 = vpop.f32.mrb[21].mxu1 }
 0x140   :  { %v553_v18 = vsub.f32 1.0, %v425_v16  ;;  %v585_v19 = vsub.f32 1.0, %v505_v17  ;;  %v427_v20 = vpop.f32.mrb[22].mxu0  ;;  %v507_v21 = vpop.f32.mrb[22].mxu1 }
 0x141   :  { %v554_v22 = vsub.f32 1.0, %v427_v20  ;;  %v586_v23 = vsub.f32 1.0, %v507_v21  ;;  %v429_v24 = vpop.f32.mrb[23].mxu0  ;;  %v509_v25 = vpop.f32.mrb[23].mxu1 }
 0x142   :  { %v928_v26 = vpack.c.bf16 %v553_v18, %v552_v14  ;;  %v944_v27 = vpack.c.bf16 %v585_v19, %v584_v15  ;;  %v555_v28 = vsub.f32 1.0, %v429_v24  ;;  %v587_v29 = vsub.f32 1.0, %v509_v25 }
 0x144   :  { %798 = vst [vmem:[#allocation2 + $0x50] sm:$0xff] %v928_v26  ;;  %814 = vst [vmem:[#allocation2 + $0xd0] sm:$0xff] %v944_v27  ;;  %v929_v30 = vpack.c.bf16 %v555_v28, %v554_v22  ;;  %v945_v31 = vpack.c.bf16 %v587_v29, %v586_v23 }
 0x146   :  { %799 = vst [vmem:[#allocation2 + $0x58] sm:$0xff] %v929_v30  ;;  %815 = vst [vmem:[#allocation2 + $0xd8] sm:$0xff] %v945_v31  ;;  %v433_v32 = vpop.f32.mrb[24].mxu0  ;;  %v513_v33 = vpop.f32.mrb[24].mxu1 }
 0x147   :  { %v556_v34 = vsub.f32 1.0, %v433_v32  ;;  %v588_v35 = vsub.f32 1.0, %v513_v33  ;;  %v435_v36 = vpop.f32.mrb[25].mxu0  ;;  %v515_v37 = vpop.f32.mrb[25].mxu1 }
 0x148   :  { %v557_v38 = vsub.f32 1.0, %v435_v36  ;;  %v589_v39 = vsub.f32 1.0, %v515_v37  ;;  %v437_v40 = vpop.f32.mrb[26].mxu0  ;;  %v517_v41 = vpop.f32.mrb[26].mxu1 }
 0x149   :  { %v558_v42 = vsub.f32 1.0, %v437_v40  ;;  %v590_v43 = vsub.f32 1.0, %v517_v41  ;;  %v439_v44 = vpop.f32.mrb[27].mxu0  ;;  %v519_v45 = vpop.f32.mrb[27].mxu1 }
 0x14a   :  { %v930_v46 = vpack.c.bf16 %v557_v38, %v556_v34  ;;  %v946_v47 = vpack.c.bf16 %v589_v39, %v588_v35  ;;  %v559_v48 = vsub.f32 1.0, %v439_v44  ;;  %v591_v49 = vsub.f32 1.0, %v519_v45 }
 0x14c   :  { %800 = vst [vmem:[#allocation2 + $0x60] sm:$0xff] %v930_v46  ;;  %816 = vst [vmem:[#allocation2 + $0xe0] sm:$0xff] %v946_v47  ;;  %v931_v50 = vpack.c.bf16 %v559_v48, %v558_v42  ;;  %v947_v51 = vpack.c.bf16 %v591_v49, %v590_v43 }
 0x14e   :  { %801 = vst [vmem:[#allocation2 + $0x68] sm:$0xff] %v931_v50  ;;  %817 = vst [vmem:[#allocation2 + $0xe8] sm:$0xff] %v947_v51  ;;  %v443_v52 = vpop.f32.mrb[28].mxu0  ;;  %v523_v53 = vpop.f32.mrb[28].mxu1 }
 0x14f   :  { %v560_v54 = vsub.f32 1.0, %v443_v52  ;;  %v592_v55 = vsub.f32 1.0, %v523_v53  ;;  %v445_v56 = vpop.f32.mrb[29].mxu0  ;;  %v525_v57 = vpop.f32.mrb[29].mxu1 }
 0x150   :  { %v561_v58 = vsub.f32 1.0, %v445_v56  ;;  %v593_v59 = vsub.f32 1.0, %v525_v57  ;;  %v447_v60 = vpop.f32.mrb[30].mxu0  ;;  %v527_v61 = vpop.f32.mrb[30].mxu1 }
 0x151   :  { %v562_v62 = vsub.f32 1.0, %v447_v60  ;;  %v594_v63 = vsub.f32 1.0, %v527_v61  ;;  %v449_v0 = vpop.f32.mrb[31].mxu0  ;;  %v529_v1 = vpop.f32.mrb[31].mxu1 }
 0x152   :  { %v932_v2 = vpack.c.bf16 %v561_v58, %v560_v54  ;;  %v948_v3 = vpack.c.bf16 %v593_v59, %v592_v55  ;;  %v563_v4 = vsub.f32 1.0, %v449_v0  ;;  %v595_v5 = vsub.f32 1.0, %v529_v1 }
 0x154   :  { %802 = vst [vmem:[#allocation2 + $0x70] sm:$0xff] %v932_v2  ;;  %818 = vst [vmem:[#allocation2 + $0xf0] sm:$0xff] %v948_v3  ;;  %v933_v6 = vpack.c.bf16 %v563_v4, %v562_v62  ;;  %v949_v7 = vpack.c.bf16 %v595_v5, %v594_v63 }
 0x156   :  { %803 = vst [vmem:[#allocation2 + $0x78] sm:$0xff] %v933_v6  ;;  %819 = vst [vmem:[#allocation2 + $0xf8] sm:$0xff] %v949_v7 }
 0x157   :  { %1076 = shalt.err (!%p1073_p4)
}
 0x158   :  { %s1077_s20 = scalar_lea.hbm %s1273_s2, 4096 }
 0x159   :  { %p1078_p5 = scmp.ne.s32.totalorder %s1273_s2, %s1077_s20  ;;  %p1081_p6 = scmp.lt.u32.totalorder %s1077_s20, %s1273_s2 }
 0x15b   :  { %p1083_p7 = pnand %p1081_p6, %p1078_p5 }
 0x15d   :  { %1086 = shalt.err (!%p1083_p7)
}
 0x15e   :  { %s1090_s24 = smov 128   ;;  %s1091_s25 = smov 8  }
 0x15f   :  { %831 = dma.vmem_to_hbm [thread:$0]  %s826_s16, 4096, %s1273_s2, [#allocation3], %s1090_s24, %s1090_s24, %s1091_s25  }
 0x160   :  { %1087 = dma.done.wait [#allocation3], 4096  }
 0x161   :  { %1088 = vsyncadd [#allocation3], 4294963200 }
 0x162   :  { %835 = vsyncpa [#allocation3], 1 }

</bundles_post_ra>
